<compile_context>
chip_gen: v7x
topology: tpu7x:2x2x1
jax: 0.10.0
libtpu: 0.0.40
codegen_flags: <defaults>
</compile_context>

<pallas_src>
import functools

import jax
import jax.numpy as jnp
from jax.experimental import pallas as pl
from jax.experimental.pallas import tpu as pltpu

LANE = 128


def _round_up(n, m):
    return ((n + m - 1) // m) * m


def _pad_axis(a, new_size, axis):
    pad = new_size - a.shape[axis]
    if pad == 0:
        return a
    widths = [(0, 0)] * a.ndim
    widths[axis] = (0, pad)
    return jnp.pad(a, widths)


def _full_spec(shape):
    ndim = len(shape)
    return pl.BlockSpec(shape, lambda i, _n=ndim: (0,) * _n)


def mlp_kernel(x_ref, w1_ref, b1_ref, w2_ref, b2_ref, w3_ref, b3_ref, o_ref):
    """Fused 3-layer MLP on one batch tile.

    Matmuls run on the MXU in the weights' dtype (bf16 by default) with explicit
    f32 accumulation; bias add / ReLU stay in f32 on the VPU.  Hidden dims are
    lane-padded to 128 (zero columns stay exactly zero through bias+ReLU); the
    final output is stored un-padded (num_y lanes).
    """
    cd = w1_ref.dtype
    x = x_ref[...].astype(cd)                       # in-kernel cast (no extra HBM pass)
    # Layer 0: Linear + ReLU
    h = jnp.dot(x, w1_ref[...], preferred_element_type=jnp.float32)
    h = jnp.maximum(h + b1_ref[...], 0.0)
    # Layer 1: Linear + ReLU
    h = jnp.dot(h.astype(cd), w2_ref[...], preferred_element_type=jnp.float32)
    h = jnp.maximum(h + b2_ref[...], 0.0)
    # Layer 2 (last): Linear, no activation
    h = jnp.dot(h.astype(cd), w3_ref[...], preferred_element_type=jnp.float32)
    o_ref[...] = (h + b3_ref[...]).astype(o_ref.dtype)


def prepare_params(params, compute_dtype=jnp.bfloat16):
    """Pad hidden dims to 128 lanes and cast weights once (outside the hot path).

    Padded weight columns / rows and padded bias entries are zero, so padded
    hidden activations are relu(0 + 0) = 0 and contribute nothing.  The output
    dim of w3/b3 is NOT padded: the kernel stores the real num_y lanes.
    """
    w1, b1 = params["w1"], params["b1"]
    w2, b2 = params["w2"], params["b2"]
    w3, b3 = params["w3"], params["b3"]
    width = w1.shape[1]
    w_pad = _round_up(width, LANE)
    return {
        "w1": _pad_axis(w1, w_pad, 1).astype(compute_dtype),
        "b1": _pad_axis(b1, w_pad, 1).astype(jnp.float32),
        "w2": _pad_axis(_pad_axis(w2, w_pad, 0), w_pad, 1).astype(compute_dtype),
        "b2": _pad_axis(b2, w_pad, 1).astype(jnp.float32),
        "w3": _pad_axis(w3, w_pad, 0).astype(compute_dtype),
        "b3": b3.astype(jnp.float32),
    }


def _pick_batch_tile(B):
    # Largest multiple-of-8 candidate that divides B while keeping >=2 grid
    # steps (so v7x's two TensorCores both get work via the "parallel" axis).
    # Big tiles amortize the ~0.35us per-grid-step overhead on v5e/v6e.
    for cand in (8192, 4096, 2048, 1024, 512, 256, 128, 64, 32, 16, 8):
        if B % cand == 0 and B // cand >= 2:
            return cand
    return B  # tiny / awkward batch: single grid step over the full array


@functools.partial(jax.jit, static_argnames=("batch_tile",))
def default_model_forward(x, prepped, *, batch_tile=None):
    """x: [B, num_x] float32.  prepped: output of prepare_params()."""
    B, num_x = x.shape
    w1p, b1p = prepped["w1"], prepped["b1"]
    w2p, b2p = prepped["w2"], prepped["b2"]
    w3p, b3p = prepped["w3"], prepped["b3"]
    w_pad = w1p.shape[1]
    num_y = w3p.shape[1]

    if batch_tile is None:
        batch_tile = _pick_batch_tile(B)
    if B % batch_tile != 0:
        raise ValueError(f"batch {B} must be divisible by batch_tile {batch_tile}")
    if batch_tile != B and batch_tile % 8 != 0:
        raise ValueError("batch_tile must be a multiple of 8 (sublane tiling)")
    grid = (B // batch_tile,)

    grid_spec = pl.GridSpec(
        grid=grid,
        in_specs=[
            pl.BlockSpec((batch_tile, num_x), lambda i: (i, 0)),
            _full_spec(w1p.shape), _full_spec(b1p.shape),
            _full_spec(w2p.shape), _full_spec(b2p.shape),
            _full_spec(w3p.shape), _full_spec(b3p.shape),
        ],
        out_specs=pl.BlockSpec((batch_tile, num_y), lambda i: (i, 0)),
    )

    weight_bytes = sum(int(a.size) * a.dtype.itemsize
                       for a in (w1p, b1p, w2p, b2p, w3p, b3p))
    cost = pl.CostEstimate(
        flops=2 * B * (num_x * w_pad + w_pad * w_pad + w_pad * num_y),
        transcendentals=0,
        bytes_accessed=B * num_x * x.dtype.itemsize + B * num_y * 4 + weight_bytes,
    )

    out = pl.pallas_call(
        mlp_kernel,
        out_shape=jax.ShapeDtypeStruct((B, num_y), jnp.float32),
        grid_spec=grid_spec,
        cost_estimate=cost,
        compiler_params=pltpu.CompilerParams(
            dimension_semantics=("parallel",),
            vmem_limit_bytes=48 * 1024 * 1024),
    )(x, w1p, b1p, w2p, b2p, w3p, b3p)
    return out


def init_params(key, num_x, num_y, depth=3, width=16):
    """Deterministic PyTorch-Linear-style init (uniform(-1/sqrt(in), 1/sqrt(in)))."""
    params = {}
    prev = num_x
    sizes = []
    for i in range(depth):
        out = num_y if i == depth - 1 else width
        sizes.append((prev, out))
        prev = out
    for idx, (fan_in, fan_out) in enumerate(sizes, start=1):
        key, kw, kb = jax.random.split(key, 3)
        bound = 1.0 / jnp.sqrt(jnp.float32(fan_in))
        params[f"w{idx}"] = jax.random.uniform(
            kw, (fan_in, fan_out), jnp.float32, -bound, bound)
        params[f"b{idx}"] = jax.random.uniform(
            kb, (1, fan_out), jnp.float32, -bound, bound)
    return params


def reference_forward(x, params, compute_dtype=jnp.float32):
    """Plain-JAX reference with the same compute-dtype convention as the kernel."""
    cd = compute_dtype

    def lin(h, w, b):
        return jnp.dot(h.astype(cd), w.astype(cd),
                       preferred_element_type=jnp.float32) + b

    h = jnp.maximum(lin(x, params["w1"], params["b1"]), 0.0)
    h = jnp.maximum(lin(h, params["w2"], params["b2"]), 0.0)
    return lin(h, params["w3"], params["b3"])


if __name__ == "__main__":
    # Small shapes consistent with the module: batch=8, num_x=32, width=16, num_y=8
    B, NUM_X, WIDTH, NUM_Y = 8, 32, 16, 8
    key = jax.random.PRNGKey(0)
    key, kx = jax.random.split(key)
    x = jax.random.normal(kx, (B, NUM_X), jnp.float32)
    params = init_params(key, NUM_X, NUM_Y, depth=3, width=WIDTH)

    # Pad/cast weights once (hoisted out of the per-call path).
    prepped_f32 = prepare_params(params, compute_dtype=jnp.float32)
    prepped_bf16 = prepare_params(params, compute_dtype=jnp.bfloat16)

    # f32 compute path: checked tightly against the plain-JAX f32 reference.
    out_f32 = default_model_forward(x, prepped_f32)
    # bf16 matmul operands (default fast path on v6e/v7x).
    out_bf16 = default_model_forward(x, prepped_bf16)
    out_f32, out_bf16 = jax.block_until_ready((out_f32, out_bf16))

    assert out_f32.shape == (B, NUM_Y) and out_bf16.shape == (B, NUM_Y)
    ref_f32 = reference_forward(x, params, jnp.float32)
    ref_bf16 = reference_forward(x, params, jnp.bfloat16)
    assert jnp.allclose(out_f32, ref_f32, atol=1e-4, rtol=1e-4)
    assert jnp.allclose(out_bf16, ref_bf16, atol=1e-3, rtol=1e-3)
    print("KERNEL_OK")
</pallas_src>

<mosaic_0001>
module attributes {stable_mosaic.version = 11 : i64} {
  func.func @mlp_kernel(%arg0: i32, %arg1: memref<8x32xf32, #tpu.memory_space<vmem>>, %arg2: memref<32x128xf32, #tpu.memory_space<vmem>>, %arg3: memref<1x128xf32, #tpu.memory_space<vmem>>, %arg4: memref<128x128xf32, #tpu.memory_space<vmem>>, %arg5: memref<1x128xf32, #tpu.memory_space<vmem>>, %arg6: memref<128x8xf32, #tpu.memory_space<vmem>>, %arg7: memref<1x8xf32, #tpu.memory_space<vmem>>, %arg8: memref<8x8xf32, #tpu.memory_space<vmem>>) attributes {dimension_semantics = [#tpu.dimension_semantics<parallel>], iteration_bounds = array<i64: 1>, scalar_prefetch = 0 : i64, scratch_operands = 0 : i64, tpu.core_type = #tpu.core_type<tc>, window_params = [{transform_indices = @transform_0, window_bounds = array<i64: 8, 32>}, {pipeline_mode = #tpu.pipeline_mode<synchronous>, transform_indices = @transform_1, window_bounds = array<i64: 32, 128>}, {pipeline_mode = #tpu.pipeline_mode<synchronous>, transform_indices = @transform_2, window_bounds = array<i64: 1, 128>}, {pipeline_mode = #tpu.pipeline_mode<synchronous>, transform_indices = @transform_3, window_bounds = array<i64: 128, 128>}, {pipeline_mode = #tpu.pipeline_mode<synchronous>, transform_indices = @transform_4, window_bounds = array<i64: 1, 128>}, {pipeline_mode = #tpu.pipeline_mode<synchronous>, transform_indices = @transform_5, window_bounds = array<i64: 128, 8>}, {pipeline_mode = #tpu.pipeline_mode<synchronous>, transform_indices = @transform_6, window_bounds = array<i64: 1, 8>}, {transform_indices = @transform_7, window_bounds = array<i64: 8, 8>}]} {
    %c0 = arith.constant 0 : index
    %c0_0 = arith.constant 0 : index
    %0 = vector.load %arg1[%c0, %c0_0] : memref<8x32xf32, #tpu.memory_space<vmem>>, vector<8x32xf32>
    %c0_1 = arith.constant 0 : index
    %c0_2 = arith.constant 0 : index
    %1 = vector.load %arg2[%c0_1, %c0_2] : memref<32x128xf32, #tpu.memory_space<vmem>>, vector<32x128xf32>
    %cst = arith.constant dense<0.000000e+00> : vector<8x128xf32>
    %2 = tpu.matmul %0, %1, %cst {dimension_numbers = #tpu.dot_dimension_numbers<[1], [0], [0], [1], [0, 0, 1, 1], [], []>} : vector<8x32xf32>, vector<32x128xf32>, vector<8x128xf32> -> vector<8x128xf32>
    %c0_3 = arith.constant 0 : index
    %c0_4 = arith.constant 0 : index
    %3 = vector.load %arg3[%c0_3, %c0_4] : memref<1x128xf32, #tpu.memory_space<vmem>>, vector<1x128xf32>
    %4 = vector.broadcast %3 : vector<1x128xf32> to vector<8x128xf32>
    %5 = arith.addf %2, %4 : vector<8x128xf32>
    %cst_5 = arith.constant 0.000000e+00 : f32
    %6 = vector.broadcast %cst_5 : f32 to vector<8x128xf32>
    %7 = arith.maximumf %5, %6 : vector<8x128xf32>
    %c0_6 = arith.constant 0 : index
    %c0_7 = arith.constant 0 : index
    %8 = vector.load %arg4[%c0_6, %c0_7] : memref<128x128xf32, #tpu.memory_space<vmem>>, vector<128x128xf32>
    %cst_8 = arith.constant dense<0.000000e+00> : vector<8x128xf32>
    %9 = tpu.matmul %7, %8, %cst_8 {dimension_numbers = #tpu.dot_dimension_numbers<[1], [0], [0], [1], [0, 0, 1, 1], [], []>} : vector<8x128xf32>, vector<128x128xf32>, vector<8x128xf32> -> vector<8x128xf32>
    %c0_9 = arith.constant 0 : index
    %c0_10 = arith.constant 0 : index
    %10 = vector.load %arg5[%c0_9, %c0_10] : memref<1x128xf32, #tpu.memory_space<vmem>>, vector<1x128xf32>
    %11 = vector.broadcast %10 : vector<1x128xf32> to vector<8x128xf32>
    %12 = arith.addf %9, %11 : vector<8x128xf32>
    %cst_11 = arith.constant 0.000000e+00 : f32
    %13 = vector.broadcast %cst_11 : f32 to vector<8x128xf32>
    %14 = arith.maximumf %12, %13 : vector<8x128xf32>
    %c0_12 = arith.constant 0 : index
    %c0_13 = arith.constant 0 : index
    %15 = vector.load %arg6[%c0_12, %c0_13] : memref<128x8xf32, #tpu.memory_space<vmem>>, vector<128x8xf32>
    %cst_14 = arith.constant dense<0.000000e+00> : vector<8x8xf32>
    %16 = tpu.matmul %14, %15, %cst_14 {dimension_numbers = #tpu.dot_dimension_numbers<[1], [0], [0], [1], [0, 0, 1, 1], [], []>} : vector<8x128xf32>, vector<128x8xf32>, vector<8x8xf32> -> vector<8x8xf32>
    %c0_15 = arith.constant 0 : index
    %c0_16 = arith.constant 0 : index
    %17 = vector.load %arg7[%c0_15, %c0_16] : memref<1x8xf32, #tpu.memory_space<vmem>>, vector<1x8xf32>
    %18 = vector.broadcast %17 : vector<1x8xf32> to vector<8x8xf32>
    %19 = arith.addf %16, %18 : vector<8x8xf32>
    %c0_17 = arith.constant 0 : index
    %c0_18 = arith.constant 0 : index
    %20 = vector.load %arg8[%c0_17, %c0_18] : memref<8x8xf32, #tpu.memory_space<vmem>>, vector<8x8xf32>
    tpu.vector_store %arg8[%c0_17, %c0_18], %19 {strides = array<i32>} : memref<8x8xf32, #tpu.memory_space<vmem>>, vector<8x8xf32>,
    return
  }
  func.func @transform_0(%arg0: i32) -> (i32, i32) {
    %c0_i32 = arith.constant 0 : i32
    %c0_i32_0 = arith.constant 0 : i32
    return %arg0, %c0_i32 : i32, i32
  }
  func.func @transform_1(%arg0: i32) -> (i32, i32) {
    %c0_i32 = arith.constant 0 : i32
    %c0_i32_0 = arith.constant 0 : i32
    %c0_i32_1 = arith.constant 0 : i32
    return %c0_i32, %c0_i32_0 : i32, i32
  }
  func.func @transform_2(%arg0: i32) -> (i32, i32) {
    %c0_i32 = arith.constant 0 : i32
    %c0_i32_0 = arith.constant 0 : i32
    %c0_i32_1 = arith.constant 0 : i32
    return %c0_i32, %c0_i32_0 : i32, i32
  }
  func.func @transform_3(%arg0: i32) -> (i32, i32) {
    %c0_i32 = arith.constant 0 : i32
    %c0_i32_0 = arith.constant 0 : i32
    %c0_i32_1 = arith.constant 0 : i32
    return %c0_i32, %c0_i32_0 : i32, i32
  }
  func.func @transform_4(%arg0: i32) -> (i32, i32) {
    %c0_i32 = arith.constant 0 : i32
    %c0_i32_0 = arith.constant 0 : i32
    %c0_i32_1 = arith.constant 0 : i32
    return %c0_i32, %c0_i32_0 : i32, i32
  }
  func.func @transform_5(%arg0: i32) -> (i32, i32) {
    %c0_i32 = arith.constant 0 : i32
    %c0_i32_0 = arith.constant 0 : i32
    %c0_i32_1 = arith.constant 0 : i32
    return %c0_i32, %c0_i32_0 : i32, i32
  }
  func.func @transform_6(%arg0: i32) -> (i32, i32) {
    %c0_i32 = arith.constant 0 : i32
    %c0_i32_0 = arith.constant 0 : i32
    %c0_i32_1 = arith.constant 0 : i32
    return %c0_i32, %c0_i32_0 : i32, i32
  }
  func.func @transform_7(%arg0: i32) -> (i32, i32) {
    %c0_i32 = arith.constant 0 : i32
    %c0_i32_0 = arith.constant 0 : i32
    return %arg0, %c0_i32 : i32, i32
  }
}

</mosaic_0001>

<bundles_post_ra>
// kernel: default_model_forward.1
= control target key start
LH: loop header
LB: loop body
LE: loop exit
PB: predicated region body
PF: predicated region fallthrough
CT: control target
= control target key end

     0   :  { %12 = vsyncpa [#allocation3], 0  ;;  %s765_s0 = inlined_call_operand.vmem [shape: f32[8,32], index: 0, kind: input, shape index: {}]   ;;  %s766_s1 = inlined_call_operand.hbm [shape: f32[32,128], index: 1, kind: input, shape index: {}]   ;;  %s767_s2 = inlined_call_operand.vmem [shape: f32[1,128], index: 2, kind: input, shape index: {}]   ;;  %s768_s3 = inlined_call_operand.vmem [shape: f32[128,128], index: 3, kind: input, shape index: {}]   ;;  %s769_s4 = inlined_call_operand.vmem [shape: f32[1,128], index: 4, kind: input, shape index: {}]   ;;  %s770_s5 = inlined_call_operand.vmem [shape: f32[128,8], index: 5, kind: input, shape index: {}]   ;;  %s771_s6 = inlined_call_operand.vmem [shape: f32[1,8], index: 6, kind: input, shape index: {}]   ;;  %s772_s7 = inlined_call_operand.hbm [shape: f32[8,8], index: 7, kind: output, shape index: {}]  }
   0x1   :  { %13 = vsyncpa [#allocation4], 0  ;;  %s565_s24 = smov [#allocation2]   ;;  %s517_s28 = scalar_lea.hbm %s766_s1, 512 }
   0x2   :  { %s21_s25 = sshll.u32 %s565_s24, 4  ;;  %p518_p0 = scmp.ne.s32.totalorder %s766_s1, %s517_s28  ;;  %s22_s25 = int_to_ptr.vmem [resolvable:$true] %s21_s25 }
   0x3   :  { %p521_p1 = scmp.lt.u32.totalorder %s517_s28, %s766_s1 }
   0x5   :  { %p523_p2 = pnand %p521_p1, %p518_p0 }
   0x7   :  { %526 = shalt.err (!%p523_p2)
}
   0x8   :  { %s527_s10 = scalar_lea.vmem %s22_s25, 512  ;;  %p532_p4 = scmp.lt.s32.totalorder %s22_s25, %s22_s25 }
   0x9   :  { %p528_p3 = scmp.ne.s32.totalorder %s22_s25, %s527_s10  ;;  %p533_p5 = scmp.lt.s32.totalorder %s527_s10, %s527_s10 }
   0xb   :  { %p534_p6 = por %p533_p5, %p532_p4 }
   0xd   :  { %p535_p7 = pnand %p534_p6, %p528_p3 }
   0xf   :  { %538 = shalt.err (!%p535_p7)
}
  0x10   :  { %s566_s11 = smov 128   ;;  %s567_s12 = smov 8  }
  0x11   :  { %27 = dma.hbm_to_vmem [thread:$0]  %s766_s1, 512, %s22_s25, [#allocation3], %s566_s11, %s566_s11, %s567_s12  }
  0x12   :  { %561 = dma.done.wait [#allocation3], 512  }
  0x13   :  { %562 = vsyncadd [#allocation3], 4294966784  ;;  %v568_v0 = vmov 0.0|0.0   ;;  %vm569_vm0 = vmmov 0   ;;  %v570_v1 = vmov 0.0   ;;  %v42_v2 = vld [vmem:[#allocation2] sm:$0xff] }
  0x14   :  { %456 = vmatprep.subr.bf16.mxu0 %v568_v0  ;;  %383 = vmatprep.mubr.msk.f32.mxu0 %vm569_vm0, %v570_v1  ;;  %v43_v3 = vld [vmem:[#allocation2 + $0x8] sm:$0xff]  ;;  %v44_v4 = vld [vmem:[#allocation2 + $0x10] sm:$0xff]  ;;  %v45_v6 = vld [vmem:[#allocation2 + $0x18] sm:$0xff]  ;;  %vm53_vm1 = vcmask 261120   ;;  %s571_s9 = smov [#allocation5]   ;;  %vm315_vm2 = vcmask 64512  }
  0x15   :  { %462 = vmatprep.subr.bf16.mxu1 %v568_v0  ;;  %418 = vmatprep.mubr.msk.f32.mxu1 %vm569_vm0, %v570_v1  ;;  %v457_v5 = vpack.c.bf16 %v43_v3, %v42_v2  ;;  %v128_v7 = vld [vmem:[%s768_s3] sm:$0xff]  ;;  %v129_v8 = vld [vmem:[%s768_s3 + $0x8] sm:$0xff]  ;;  %v130_v9 = vld [vmem:[%s768_s3 + $0x10] sm:$0xff]  ;;  %v460_v11 = vpack.c.bf16 %v45_v6, %v44_v4  ;;  %s323_s10 = sshll.u32 %s571_s9, 4  ;;  %s324_s10 = int_to_ptr.vmem [resolvable:$true] %s323_s10 }
  0x16   :  { %v131_v10 = vld [vmem:[%s768_s3 + $0x18] sm:$0xff]  ;;  %v463_v12 = vpack.c.bf16 %v129_v8, %v128_v7  ;;  %v132_v14 = vld [vmem:[%s768_s3 + $0x20] sm:$0xff]  ;;  %v133_v15 = vld [vmem:[%s768_s3 + $0x28] sm:$0xff]  ;;  %p544_p9 = scmp.lt.s32.totalorder %s324_s10, %s324_s10 }
  0x17   :  { %458 = vmatpush3.bf16.msra.mxu0 %v457_v5  ;;  %v466_v13 = vpack.c.bf16 %v131_v10, %v130_v9  ;;  %v41_v16 = vld [vmem:[%s765_s0] sm:$0xff]  ;;  %v469_v17 = vpack.c.bf16 %v133_v15, %v132_v14  ;;  %v134_v18 = vld [vmem:[%s768_s3 + $0x30] sm:$0xff]  ;;  %v135_v19 = vld [vmem:[%s768_s3 + $0x38] sm:$0xff] }
  0x18   :  { %459 = vmatprep.subr.bf16.mxu0 %v568_v0  ;;  %464 = vmatpush3.bf16.msra.mxu1 %v463_v12  ;;  %v472_v20 = vpack.c.bf16 %v135_v19, %v134_v18  ;;  %v136_v21 = vld [vmem:[%s768_s3 + $0x40] sm:$0xff]  ;;  %v137_v22 = vld [vmem:[%s768_s3 + $0x48] sm:$0xff]  ;;  %v138_v24 = vld [vmem:[%s768_s3 + $0x50] sm:$0xff] }
  0x19   :  { %465 = vmatprep.subr.bf16.mxu1 %v568_v0  ;;  %v475_v23 = vpack.c.bf16 %v137_v22, %v136_v21  ;;  %v139_v25 = vld [vmem:[%s768_s3 + $0x58] sm:$0xff]  ;;  %v140_v27 = vld [vmem:[%s768_s3 + $0x60] sm:$0xff]  ;;  %v141_v28 = vld [vmem:[%s768_s3 + $0x68] sm:$0xff] }
  0x1a   :  { %v478_v26 = vpack.c.bf16 %v139_v25, %v138_v24  ;;  %v481_v29 = vpack.c.bf16 %v141_v28, %v140_v27  ;;  %v142_v30 = vld [vmem:[%s768_s3 + $0x70] sm:$0xff]  ;;  %v143_v31 = vld [vmem:[%s768_s3 + $0x78] sm:$0xff]  ;;  %v222_v33 = vld [vmem:[%s770_s5] sm:$0xff] }
  0x1b   :  { %461 = vmatpush3.bf16.msra.mxu0 %v460_v11  ;;  %v484_v32 = vpack.c.bf16 %v143_v31, %v142_v30  ;;  %v223_v34 = vld [vmem:[%s770_s5 + $0x8] sm:$0xff]  ;;  %v224_v35 = vld [vmem:[%s770_s5 + $0x10] sm:$0xff]  ;;  %v225_v37 = vld [vmem:[%s770_s5 + $0x18] sm:$0xff] }
  0x1c   :  { %486 = vmatprep.subr.bf16.mxu0 %v568_v0  ;;  %467 = vmatpush3.bf16.msra.mxu1 %v466_v13  ;;  %v487_v36 = vpack.c.bf16 %v223_v34, %v222_v33  ;;  %v490_v38 = vpack.c.bf16 %v225_v37, %v224_v35  ;;  %v226_v39 = vld [vmem:[%s770_s5 + $0x20] sm:$0xff]  ;;  %v227_v40 = vld [vmem:[%s770_s5 + $0x28] sm:$0xff]  ;;  %v228_v42 = vld [vmem:[%s770_s5 + $0x30] sm:$0xff] }
  0x1d   :  { %468 = vmatprep.subr.bf16.mxu1 %v568_v0  ;;  %v493_v41 = vpack.c.bf16 %v227_v40, %v226_v39  ;;  %v229_v43 = vld [vmem:[%s770_s5 + $0x38] sm:$0xff]  ;;  %v230_v45 = vld [vmem:[%s770_s5 + $0x40] sm:$0xff]  ;;  %v231_v46 = vld [vmem:[%s770_s5 + $0x48] sm:$0xff] }
  0x1e   :  { %384 = vmatmul.mubr.msk.f32.vlgmr.msra.gmra.mrb[0].mxu0 %vm53_vm1, %v41_v16  ;;  %v496_v44 = vpack.c.bf16 %v229_v43, %v228_v42  ;;  %v499_v47 = vpack.c.bf16 %v231_v46, %v230_v45  ;;  %v232_v48 = vld [vmem:[%s770_s5 + $0x50] sm:$0xff]  ;;  %v233_v49 = vld [vmem:[%s770_s5 + $0x58] sm:$0xff]  ;;  %v234_v51 = vld [vmem:[%s770_s5 + $0x60] sm:$0xff] }
  0x1f   :  { %453 = vmatprep.mubr.msk.f32.mxu0 %vm569_vm0, %v570_v1  ;;  %488 = vmatpush3.bf16.msra.mxu0 %v487_v36  ;;  %v502_v50 = vpack.c.bf16 %v233_v49, %v232_v48  ;;  %v235_v52 = vld [vmem:[%s770_s5 + $0x68] sm:$0xff]  ;;  %v332_v54 = vld [vmem:[%s767_s2] ss:$0 sm:$0xff]  ;;  %v236_v59 = vld [vmem:[%s770_s5 + $0x70] sm:$0xff] }
  0x20   :  { %470 = vmatpush3.bf16.msra.mxu1 %v469_v17  ;;  %489 = vmatprep.subr.bf16.mxu0 %v568_v0  ;;  %v505_v53 = vpack.c.bf16 %v235_v52, %v234_v51  ;;  %v237_v60 = vld [vmem:[%s770_s5 + $0x78] sm:$0xff]  ;;  %v334_v62 = vld [vmem:[%s769_s4] ss:$0 sm:$0xff]  ;;  %s539_s5 = scalar_lea.vmem %s324_s10, 128 }
  0x21   :  { %471 = vmatprep.subr.bf16.mxu1 %v568_v0  ;;  %v508_v61 = vpack.c.bf16 %v237_v60, %v236_v59  ;;  %v335_v3 = vld [vmem:[%s771_s6] ss:$0 sm:$0xff]  ;;  %p540_p8 = scmp.ne.s32.totalorder %s324_s10, %s539_s5  ;;  %p545_p10 = scmp.lt.s32.totalorder %s539_s5, %s539_s5 }
  0x23   :  { %491 = vmatpush3.bf16.msra.mxu0 %v490_v38  ;;  %p546_p11 = por %p545_p10, %p544_p9 }
  0x24   :  { %473 = vmatpush3.bf16.msra.mxu1 %v472_v20  ;;  %492 = vmatprep.subr.bf16.mxu0 %v568_v0 }
  0x25   :  { %474 = vmatprep.subr.bf16.mxu1 %v568_v0  ;;  %p547_p12 = pnand %p546_p11, %p540_p8 }
  0x27   :  { %494 = vmatpush3.bf16.msra.mxu0 %v493_v41 }
  0x28   :  { %476 = vmatpush3.bf16.msra.mxu1 %v475_v23  ;;  %495 = vmatprep.subr.bf16.mxu0 %v568_v0 }
  0x29   :  { %477 = vmatprep.subr.bf16.mxu1 %v568_v0 }
  0x2b   :  { %497 = vmatpush3.bf16.msra.mxu0 %v496_v44 }
  0x2c   :  { %479 = vmatpush3.bf16.msra.mxu1 %v478_v26  ;;  %498 = vmatprep.subr.bf16.mxu0 %v568_v0 }
  0x2d   :  { %480 = vmatprep.subr.bf16.mxu1 %v568_v0 }
  0x2f   :  { %500 = vmatpush3.bf16.msra.mxu0 %v499_v47 }
  0x30   :  { %482 = vmatpush3.bf16.msra.mxu1 %v481_v29  ;;  %501 = vmatprep.subr.bf16.mxu0 %v568_v0 }
  0x31   :  { %483 = vmatprep.subr.bf16.mxu1 %v568_v0 }
  0x33   :  { %503 = vmatpush3.bf16.msra.mxu0 %v502_v50 }
  0x34   :  { %485 = vmatpush3.bf16.msra.mxu1 %v484_v32  ;;  %504 = vmatprep.subr.bf16.mxu0 %v568_v0 }
  0x37   :  { %506 = vmatpush3.bf16.msra.mxu0 %v505_v53 }
  0x38   :  { %507 = vmatprep.subr.bf16.mxu0 %v568_v0 }
  0x3b   :  { %509 = vmatpush3.bf16.msra.mxu0 %v508_v61 }
  0xf1   :  { %v123_v55 = vpop.f32.mrb[0].mxu0 }
  0xf2   :  { %v124_v56 = vadd.f32 %v332_v54, %v123_v55  ;;  %v385_v57 = vpop.f32.mrb[1].mxu0 }
  0xf4   :  { %v127_v58 = vmax.f32 %v124_v56, 0.0 }
  0xf6   :  { %419 = vmatmul.mubr.f32.vlgmr.msra.gmra.mrb[0].mxu1 %v127_v58 }
 0x1c9   :  { %v217_v63 = vpop.f32.mrb[0].mxu1 }
 0x1ca   :  { %v218_v0 = vadd.f32 %v334_v62, %v217_v63  ;;  %v420_v1 = vpop.f32.mrb[1].mxu1 }
 0x1cc   :  { %v221_v2 = vmax.f32 %v218_v0, 0.0 }
 0x1ce   :  { %454 = vmatmul.mubr.f32.vlgmr.msra.gmra.mrb[2].mxu0 %v221_v2 }
 0x2a1   :  { %v311_v4 = vpop.f32.mrb[2].mxu0 }
 0x2a2   :  { %v312_v5 = vadd.f32 %v335_v3, %v311_v4  ;;  %v455_v6 = vpop.f32.mrb[3].mxu0 }
 0x2a4   :  { %316 = vst.msk [vmem:[#allocation5] sm:$0xff] %vm315_vm2, %v312_v5 }
 0x2a5   :  { %550 = shalt.err (!%p547_p12)
}
 0x2a6   :  { %s551_s12 = scalar_lea.hbm %s772_s7, 128 }
 0x2a7   :  { %p552_p13 = scmp.ne.s32.totalorder %s772_s7, %s551_s12  ;;  %p555_p0 = scmp.lt.u32.totalorder %s551_s12, %s772_s7 }
 0x2a9   :  { %p557_p1 = pnand %p555_p0, %p552_p13 }
 0x2ab   :  { %560 = shalt.err (!%p557_p1)
}
 0x2ac   :  { %326 = dma.vmem_to_hbm [thread:$0]  %s324_s10, 128, %s772_s7, [#allocation4]  }
 0x2ad   :  { %563 = dma.done.wait [#allocation4], 128  }
 0x2ae   :  { %564 = vsyncadd [#allocation4], 4294967168 }
 0x2af   :  { %330 = vsyncpa [#allocation3], 1 }
 0x2b0   :  { %331 = vsyncpa [#allocation4], 1 }

</bundles_post_ra>
